<compile_context>
chip_gen: v5e
topology: v5e:2x2
jax: 0.10.0
libtpu: 0.0.40
codegen_flags: <defaults>
</compile_context>

<pallas_src>
import functools

import jax
import jax.numpy as jnp
from jax import lax
from jax.experimental import pallas as pl
from jax.experimental.pallas import tpu as pltpu


def _leaky(x):
    # F.leaky_relu(x, 0.2)
    return jnp.where(x > 0, x, 0.2 * x)


def resnet_block_kernel(x_ref, w0_ref, b0_ref, w1s_ref, b1_ref, out_ref,
                        slab0_ref, slab1_ref, *, H, W, B):
    # x_ref   : (B, Cin, H*W)          batch tile, channels on sublanes
    # w0_ref  : (Chid, 9*Cin)          conv_0 weights, cols ordered (ky, kx, ci)
    # b0_ref  : (Chid, 1)
    # w1s_ref : (Cout, 9*Chid + Cin)   [0.1*conv_1 weights | shortcut weights]
    # b1_ref  : (Cout, 1)              0.1 * conv_1 bias
    # out_ref : (B, Cout, H*W)
    # slab0_ref: VMEM (9*Cin, H*W)       f32 im2col scratch for conv_0
    # slab1_ref: VMEM (9*Chid+Cin, H*W)  f32 im2col + shortcut scratch for conv_1
    HW = H * W
    Cin = x_ref.shape[1]
    Chid = w0_ref.shape[0]

    # --- per-pixel (row, col) indices along the lane axis, once per step ---
    pos = lax.broadcasted_iota(jnp.int32, (1, HW), 1)
    if (W & (W - 1)) == 0:                           # power-of-two width
        col = jnp.bitwise_and(pos, W - 1)
        row = jnp.right_shift(pos, W.bit_length() - 1)
    else:                                            # generic fallback
        col = pos % W
        row = pos // W

    # 4 base boundary predicates (SAME zero-padding of the activated input).
    up_ok = row >= 1          # dy = -1 taps valid
    dn_ok = row < H - 1       # dy = +1
    lf_ok = col >= 1          # dx = -1
    rt_ok = col < W - 1       # dx = +1

    def build_slab(a, slab_ref, C):
        # a: (C, HW) activated input -> slab rows [t*C:(t+1)*C] hold tap t.
        for t in range(9):
            dy, dx = t // 3 - 1, t % 3 - 1
            delta = dy * W + dx
            if delta == 0:
                shifted = a
            else:
                # shifted[:, p] == a[:, p + delta]  (jnp.roll semantics)
                shifted = pltpu.roll(a, shift=(-delta) % HW, axis=1)
            m = None
            if dy == -1:
                m = up_ok
            elif dy == 1:
                m = dn_ok
            if dx == -1:
                m = lf_ok if m is None else jnp.logical_and(m, lf_ok)
            elif dx == 1:
                m = rt_ok if m is None else jnp.logical_and(m, rt_ok)
            if m is not None:
                shifted = jnp.where(m, shifted, 0.0)
            slab_ref[t * C:(t + 1) * C, :] = shifted

    w0 = w0_ref[...]
    b0 = b0_ref[...]
    w1s = w1s_ref[...]
    b1s = b1_ref[...]

    for b in range(B):
        x = x_ref[b]                                             # (Cin, HW)

        # conv_0(actvn(x)) + b0  -- one MXU matmul.
        build_slab(_leaky(x), slab0_ref, Cin)
        h = jnp.dot(w0, slab0_ref[...],
                    preferred_element_type=jnp.float32) + b0     # (Chid, HW)

        # 0.1 * (conv_1(actvn(h)) + b1) + conv_s(x)  -- one fused MXU matmul.
        build_slab(_leaky(h), slab1_ref, Chid)
        slab1_ref[9 * Chid:9 * Chid + Cin, :] = x                # shortcut rows
        out = jnp.dot(w1s, slab1_ref[...],
                      preferred_element_type=jnp.float32) + b1s  # (Cout, HW)

        out_ref[b] = out.astype(out_ref.dtype)


def resnet_stable_block(x_nchw, params, *, b_tile=1):
    """x_nchw: (N, Cin, H, W) float32. Returns (N, Cout, H, W) float32."""
    w0, b0, w1, b1, ws = params           # w0/w1 in HWIO, ws is (Cout, Cin)
    N, Cin, H, W = x_nchw.shape
    Chid = w0.shape[3]
    Cout = w1.shape[3]
    HW = H * W
    assert N % b_tile == 0

    # Free reshape only: data stays NCHW in HBM, H*W lands on the lane axis.
    x_flat = x_nchw.reshape(N, Cin, HW)

    # Pack weights: rows = output channels, cols ordered (ky, kx, ci).
    w0p = jnp.transpose(w0.reshape(9 * Cin, Chid))        # (Chid, 9*Cin)
    w1p = jnp.transpose(w1.reshape(9 * Chid, Cout))       # (Cout, 9*Chid)
    # Fuse the 0.1 residual scale and the 1x1 shortcut into conv_1's matmul.
    w1s = jnp.concatenate([0.1 * w1p, ws], axis=1)        # (Cout, 9*Chid+Cin)
    b0c = b0.reshape(Chid, 1)
    b1c = (0.1 * b1).reshape(Cout, 1)

    kernel = functools.partial(resnet_block_kernel, H=H, W=W, B=b_tile)

    out_flat = pl.pallas_call(
        kernel,
        out_shape=jax.ShapeDtypeStruct((N, Cout, HW), jnp.float32),
        grid_spec=pltpu.PrefetchScalarGridSpec(
            num_scalar_prefetch=0,
            grid=(N // b_tile,),
            in_specs=[
                pl.BlockSpec((b_tile, Cin, HW),       lambda n: (n, 0, 0)),
                pl.BlockSpec((Chid, 9 * Cin),         lambda n: (0, 0)),
                pl.BlockSpec((Chid, 1),               lambda n: (0, 0)),
                pl.BlockSpec((Cout, 9 * Chid + Cin),  lambda n: (0, 0)),
                pl.BlockSpec((Cout, 1),               lambda n: (0, 0)),
            ],
            out_specs=pl.BlockSpec((b_tile, Cout, HW), lambda n: (n, 0, 0)),
            scratch_shapes=[
                pltpu.VMEM((9 * Cin, HW), jnp.float32),
                pltpu.VMEM((9 * Chid + Cin, HW), jnp.float32),
            ],
        ),
        compiler_params=pltpu.CompilerParams(
            dimension_semantics=("parallel",)),
    )(x_flat, w0p, b0c, w1s, b1c)

    return out_flat.reshape(N, Cout, H, W)


def _reference(x_nchw, params):
    """Pure-JAX reference of the PyTorch forward (for verification)."""
    w0, b0, w1, b1, ws = params
    Cout, Cin = ws.shape
    hi = jax.lax.Precision.HIGHEST
    x = jnp.transpose(x_nchw, (0, 2, 3, 1))
    dn = ("NHWC", "HWIO", "NHWC")
    a = _leaky(x)
    h = jax.lax.conv_general_dilated(a, w0, (1, 1), "SAME",
                                     dimension_numbers=dn, precision=hi) + b0
    h = _leaky(h)
    d = jax.lax.conv_general_dilated(h, w1, (1, 1), "SAME",
                                     dimension_numbers=dn, precision=hi) + b1
    xs = jax.lax.conv_general_dilated(x, jnp.transpose(ws).reshape(1, 1, Cin, Cout),
                                      (1, 1), "SAME", dimension_numbers=dn,
                                      precision=hi)
    out = xs + 0.1 * d
    return jnp.transpose(out, (0, 3, 1, 2))


if __name__ == "__main__":
    # fin=4, fout=8 -> learned shortcut, fhidden = min(fin, fout) = 4, is_bias=True.
    N, Cin, H, W = 2, 4, 16, 16
    Cout = 8
    Chid = min(Cin, Cout)

    key = jax.random.PRNGKey(0)
    kx, k0, kb0, k1, kb1, ks = jax.random.split(key, 6)
    x = jax.random.normal(kx, (N, Cin, H, W), jnp.float32)
    # Deterministic synthetic parameters (convs in HWIO layout, shortcut (Cout, Cin)).
    w0 = jax.random.normal(k0, (3, 3, Cin, Chid), jnp.float32) * 0.1
    b0 = jax.random.normal(kb0, (Chid,), jnp.float32) * 0.1
    w1 = jax.random.normal(k1, (3, 3, Chid, Cout), jnp.float32) * 0.1
    b1 = jax.random.normal(kb1, (Cout,), jnp.float32) * 0.1
    ws = jax.random.normal(ks, (Cout, Cin), jnp.float32) * 0.1
    params = (w0, b0, w1, b1, ws)

    out = jax.block_until_ready(resnet_stable_block(x, params))
    ref = _reference(x, params)
    assert out.shape == (N, Cout, H, W)
    assert jnp.allclose(out, ref, atol=1e-3, rtol=1e-3), "mismatch vs reference"

    print("KERNEL_OK")
</pallas_src>

<mosaic_0001>
module attributes {stable_mosaic.version = 11 : i64} {
  func.func @resnet_block_kernel(%arg0: i32, %arg1: memref<1x4x256xf32, #tpu.memory_space<vmem>>, %arg2: memref<4x36xf32, #tpu.memory_space<vmem>>, %arg3: memref<4x1xf32, #tpu.memory_space<vmem>>, %arg4: memref<8x40xf32, #tpu.memory_space<vmem>>, %arg5: memref<8x1xf32, #tpu.memory_space<vmem>>, %arg6: memref<1x8x256xf32, #tpu.memory_space<vmem>>, %arg7: memref<36x256xf32, #tpu.memory_space<vmem>>, %arg8: memref<40x256xf32, #tpu.memory_space<vmem>>) attributes {dimension_semantics = [#tpu.dimension_semantics<parallel>], iteration_bounds = array<i64: 2>, scalar_prefetch = 0 : i64, scratch_operands = 2 : i64, tpu.core_type = #tpu.core_type<tc>, window_params = [{transform_indices = @transform_0, window_bounds = array<i64: 1, 4, 256>}, {pipeline_mode = #tpu.pipeline_mode<synchronous>, transform_indices = @transform_1, window_bounds = array<i64: 4, 36>}, {pipeline_mode = #tpu.pipeline_mode<synchronous>, transform_indices = @transform_2, window_bounds = array<i64: 4, 1>}, {pipeline_mode = #tpu.pipeline_mode<synchronous>, transform_indices = @transform_3, window_bounds = array<i64: 8, 40>}, {pipeline_mode = #tpu.pipeline_mode<synchronous>, transform_indices = @transform_4, window_bounds = array<i64: 8, 1>}, {transform_indices = @transform_5, window_bounds = array<i64: 1, 8, 256>}]} {
    %0 = tpu.iota {dimensions = array<i32: 1>} : vector<1x256xi32>
    %c15_i32 = arith.constant 15 : i32
    %1 = vector.broadcast %c15_i32 : i32 to vector<1x256xi32>
    %2 = arith.andi %0, %1 : vector<1x256xi32>
    %c4_i32 = arith.constant 4 : i32
    %3 = vector.broadcast %c4_i32 : i32 to vector<1x256xi32>
    %4 = arith.shrsi %0, %3 : vector<1x256xi32>
    %c1_i32 = arith.constant 1 : i32
    %5 = vector.broadcast %c1_i32 : i32 to vector<1x256xi32>
    %6 = arith.cmpi sge, %4, %5 : vector<1x256xi32>
    %c15_i32_0 = arith.constant 15 : i32
    %7 = vector.broadcast %c15_i32_0 : i32 to vector<1x256xi32>
    %8 = arith.cmpi slt, %4, %7 : vector<1x256xi32>
    %c1_i32_1 = arith.constant 1 : i32
    %9 = vector.broadcast %c1_i32_1 : i32 to vector<1x256xi32>
    %10 = arith.cmpi sge, %2, %9 : vector<1x256xi32>
    %c15_i32_2 = arith.constant 15 : i32
    %11 = vector.broadcast %c15_i32_2 : i32 to vector<1x256xi32>
    %12 = arith.cmpi slt, %2, %11 : vector<1x256xi32>
    %c0 = arith.constant 0 : index
    %c0_3 = arith.constant 0 : index
    %13 = vector.load %arg2[%c0, %c0_3] : memref<4x36xf32, #tpu.memory_space<vmem>>, vector<4x36xf32>
    %c0_4 = arith.constant 0 : index
    %c0_5 = arith.constant 0 : index
    %14 = vector.load %arg3[%c0_4, %c0_5] : memref<4x1xf32, #tpu.memory_space<vmem>>, vector<4x1xf32>
    %c0_6 = arith.constant 0 : index
    %c0_7 = arith.constant 0 : index
    %15 = vector.load %arg4[%c0_6, %c0_7] : memref<8x40xf32, #tpu.memory_space<vmem>>, vector<8x40xf32>
    %c0_8 = arith.constant 0 : index
    %c0_9 = arith.constant 0 : index
    %16 = vector.load %arg5[%c0_8, %c0_9] : memref<8x1xf32, #tpu.memory_space<vmem>>, vector<8x1xf32>
    %c0_10 = arith.constant 0 : index
    %c0_11 = arith.constant 0 : index
    %c0_12 = arith.constant 0 : index
    %17 = vector.load %arg1[%c0_10, %c0_11, %c0_12] : memref<1x4x256xf32, #tpu.memory_space<vmem>>, vector<1x4x256xf32>
    %18 = vector.shape_cast %17 : vector<1x4x256xf32> to vector<4x256xf32>
    %cst = arith.constant 0.000000e+00 : f32
    %19 = vector.broadcast %cst : f32 to vector<4x256xf32>
    %20 = arith.cmpf ogt, %18, %19 : vector<4x256xf32>
    %cst_13 = arith.constant 2.000000e-01 : f32
    %21 = vector.broadcast %cst_13 : f32 to vector<4x256xf32>
    %22 = arith.mulf %21, %18 : vector<4x256xf32>
    %23 = arith.select %20, %18, %22 : vector<4x256xi1>, vector<4x256xf32>
    %c17_i32 = arith.constant 17 : i32
    %24 = tpu.dynamic_rotate %23 by %c17_i32 dim 1 : vector<4x256xf32>, i32 -> vector<4x256xf32>
    %25 = arith.andi %6, %10 : vector<1x256xi1>
    %cst_14 = arith.constant 0.000000e+00 : f32
    %26 = vector.shape_cast %25 : vector<1x256xi1> to vector<1x256xi1>
    %27 = vector.broadcast %26 : vector<1x256xi1> to vector<4x256xi1>
    %28 = vector.broadcast %cst_14 : f32 to vector<4x256xf32>
    %29 = arith.select %27, %24, %28 : vector<4x256xi1>, vector<4x256xf32>
    %c0_15 = arith.constant 0 : index
    %c0_16 = arith.constant 0 : index
    %30 = vector.load %arg7[%c0_15, %c0_16] : memref<36x256xf32, #tpu.memory_space<vmem>>, vector<4x256xf32>
    tpu.vector_store %arg7[%c0_15, %c0_16], %29 {strides = array<i32>} : memref<36x256xf32, #tpu.memory_space<vmem>>, vector<4x256xf32>,
    %c16_i32 = arith.constant 16 : i32
    %31 = tpu.dynamic_rotate %23 by %c16_i32 dim 1 : vector<4x256xf32>, i32 -> vector<4x256xf32>
    %cst_17 = arith.constant 0.000000e+00 : f32
    %32 = vector.shape_cast %6 : vector<1x256xi1> to vector<1x256xi1>
    %33 = vector.broadcast %32 : vector<1x256xi1> to vector<4x256xi1>
    %34 = vector.broadcast %cst_17 : f32 to vector<4x256xf32>
    %35 = arith.select %33, %31, %34 : vector<4x256xi1>, vector<4x256xf32>
    %c4 = arith.constant 4 : index
    %c0_18 = arith.constant 0 : index
    %36 = vector.load %arg7[%c4, %c0_18] : memref<36x256xf32, #tpu.memory_space<vmem>>, vector<4x256xf32>
    tpu.vector_store %arg7[%c4, %c0_18], %35 {strides = array<i32>} : memref<36x256xf32, #tpu.memory_space<vmem>>, vector<4x256xf32>,
    %c15_i32_19 = arith.constant 15 : i32
    %37 = tpu.dynamic_rotate %23 by %c15_i32_19 dim 1 : vector<4x256xf32>, i32 -> vector<4x256xf32>
    %38 = arith.andi %6, %12 : vector<1x256xi1>
    %cst_20 = arith.constant 0.000000e+00 : f32
    %39 = vector.shape_cast %38 : vector<1x256xi1> to vector<1x256xi1>
    %40 = vector.broadcast %39 : vector<1x256xi1> to vector<4x256xi1>
    %41 = vector.broadcast %cst_20 : f32 to vector<4x256xf32>
    %42 = arith.select %40, %37, %41 : vector<4x256xi1>, vector<4x256xf32>
    %c8 = arith.constant 8 : index
    %c0_21 = arith.constant 0 : index
    %43 = vector.load %arg7[%c8, %c0_21] : memref<36x256xf32, #tpu.memory_space<vmem>>, vector<4x256xf32>
    tpu.vector_store %arg7[%c8, %c0_21], %42 {strides = array<i32>} : memref<36x256xf32, #tpu.memory_space<vmem>>, vector<4x256xf32>,
    %c1_i32_22 = arith.constant 1 : i32
    %44 = tpu.dynamic_rotate %23 by %c1_i32_22 dim 1 : vector<4x256xf32>, i32 -> vector<4x256xf32>
    %cst_23 = arith.constant 0.000000e+00 : f32
    %45 = vector.shape_cast %10 : vector<1x256xi1> to vector<1x256xi1>
    %46 = vector.broadcast %45 : vector<1x256xi1> to vector<4x256xi1>
    %47 = vector.broadcast %cst_23 : f32 to vector<4x256xf32>
    %48 = arith.select %46, %44, %47 : vector<4x256xi1>, vector<4x256xf32>
    %c12 = arith.constant 12 : index
    %c0_24 = arith.constant 0 : index
    %49 = vector.load %arg7[%c12, %c0_24] : memref<36x256xf32, #tpu.memory_space<vmem>>, vector<4x256xf32>
    tpu.vector_store %arg7[%c12, %c0_24], %48 {strides = array<i32>} : memref<36x256xf32, #tpu.memory_space<vmem>>, vector<4x256xf32>,
    %c16 = arith.constant 16 : index
    %c0_25 = arith.constant 0 : index
    %50 = vector.load %arg7[%c16, %c0_25] : memref<36x256xf32, #tpu.memory_space<vmem>>, vector<4x256xf32>
    tpu.vector_store %arg7[%c16, %c0_25], %23 {strides = array<i32>} : memref<36x256xf32, #tpu.memory_space<vmem>>, vector<4x256xf32>,
    %c255_i32 = arith.constant 255 : i32
    %51 = tpu.dynamic_rotate %23 by %c255_i32 dim 1 : vector<4x256xf32>, i32 -> vector<4x256xf32>
    %cst_26 = arith.constant 0.000000e+00 : f32
    %52 = vector.shape_cast %12 : vector<1x256xi1> to vector<1x256xi1>
    %53 = vector.broadcast %52 : vector<1x256xi1> to vector<4x256xi1>
    %54 = vector.broadcast %cst_26 : f32 to vector<4x256xf32>
    %55 = arith.select %53, %51, %54 : vector<4x256xi1>, vector<4x256xf32>
    %c20 = arith.constant 20 : index
    %c0_27 = arith.constant 0 : index
    %56 = vector.load %arg7[%c20, %c0_27] : memref<36x256xf32, #tpu.memory_space<vmem>>, vector<4x256xf32>
    tpu.vector_store %arg7[%c20, %c0_27], %55 {strides = array<i32>} : memref<36x256xf32, #tpu.memory_space<vmem>>, vector<4x256xf32>,
    %c241_i32 = arith.constant 241 : i32
    %57 = tpu.dynamic_rotate %23 by %c241_i32 dim 1 : vector<4x256xf32>, i32 -> vector<4x256xf32>
    %58 = arith.andi %8, %10 : vector<1x256xi1>
    %cst_28 = arith.constant 0.000000e+00 : f32
    %59 = vector.shape_cast %58 : vector<1x256xi1> to vector<1x256xi1>
    %60 = vector.broadcast %59 : vector<1x256xi1> to vector<4x256xi1>
    %61 = vector.broadcast %cst_28 : f32 to vector<4x256xf32>
    %62 = arith.select %60, %57, %61 : vector<4x256xi1>, vector<4x256xf32>
    %c24 = arith.constant 24 : index
    %c0_29 = arith.constant 0 : index
    %63 = vector.load %arg7[%c24, %c0_29] : memref<36x256xf32, #tpu.memory_space<vmem>>, vector<4x256xf32>
    tpu.vector_store %arg7[%c24, %c0_29], %62 {strides = array<i32>} : memref<36x256xf32, #tpu.memory_space<vmem>>, vector<4x256xf32>,
    %c240_i32 = arith.constant 240 : i32
    %64 = tpu.dynamic_rotate %23 by %c240_i32 dim 1 : vector<4x256xf32>, i32 -> vector<4x256xf32>
    %cst_30 = arith.constant 0.000000e+00 : f32
    %65 = vector.shape_cast %8 : vector<1x256xi1> to vector<1x256xi1>
    %66 = vector.broadcast %65 : vector<1x256xi1> to vector<4x256xi1>
    %67 = vector.broadcast %cst_30 : f32 to vector<4x256xf32>
    %68 = arith.select %66, %64, %67 : vector<4x256xi1>, vector<4x256xf32>
    %c28 = arith.constant 28 : index
    %c0_31 = arith.constant 0 : index
    %69 = vector.load %arg7[%c28, %c0_31] : memref<36x256xf32, #tpu.memory_space<vmem>>, vector<4x256xf32>
    tpu.vector_store %arg7[%c28, %c0_31], %68 {strides = array<i32>} : memref<36x256xf32, #tpu.memory_space<vmem>>, vector<4x256xf32>,
    %c239_i32 = arith.constant 239 : i32
    %70 = tpu.dynamic_rotate %23 by %c239_i32 dim 1 : vector<4x256xf32>, i32 -> vector<4x256xf32>
    %71 = arith.andi %8, %12 : vector<1x256xi1>
    %cst_32 = arith.constant 0.000000e+00 : f32
    %72 = vector.shape_cast %71 : vector<1x256xi1> to vector<1x256xi1>
    %73 = vector.broadcast %72 : vector<1x256xi1> to vector<4x256xi1>
    %74 = vector.broadcast %cst_32 : f32 to vector<4x256xf32>
    %75 = arith.select %73, %70, %74 : vector<4x256xi1>, vector<4x256xf32>
    %c32 = arith.constant 32 : index
    %c0_33 = arith.constant 0 : index
    %76 = vector.load %arg7[%c32, %c0_33] : memref<36x256xf32, #tpu.memory_space<vmem>>, vector<4x256xf32>
    tpu.vector_store %arg7[%c32, %c0_33], %75 {strides = array<i32>} : memref<36x256xf32, #tpu.memory_space<vmem>>, vector<4x256xf32>,
    %c0_34 = arith.constant 0 : index
    %c0_35 = arith.constant 0 : index
    %77 = vector.load %arg7[%c0_34, %c0_35] : memref<36x256xf32, #tpu.memory_space<vmem>>, vector<36x256xf32>
    %cst_36 = arith.constant dense<0.000000e+00> : vector<4x256xf32>
    %78 = tpu.matmul %13, %77, %cst_36 {dimension_numbers = #tpu.dot_dimension_numbers<[1], [0], [0], [1], [0, 0, 1, 1], [], []>} : vector<4x36xf32>, vector<36x256xf32>, vector<4x256xf32> -> vector<4x256xf32>
    %79 = vector.broadcast %14 : vector<4x1xf32> to vector<4x256xf32>
    %80 = arith.addf %78, %79 : vector<4x256xf32>
    %cst_37 = arith.constant 0.000000e+00 : f32
    %81 = vector.broadcast %cst_37 : f32 to vector<4x256xf32>
    %82 = arith.cmpf ogt, %80, %81 : vector<4x256xf32>
    %cst_38 = arith.constant 2.000000e-01 : f32
    %83 = vector.broadcast %cst_38 : f32 to vector<4x256xf32>
    %84 = arith.mulf %83, %80 : vector<4x256xf32>
    %85 = arith.select %82, %80, %84 : vector<4x256xi1>, vector<4x256xf32>
    %c17_i32_39 = arith.constant 17 : i32
    %86 = tpu.dynamic_rotate %85 by %c17_i32_39 dim 1 : vector<4x256xf32>, i32 -> vector<4x256xf32>
    %87 = arith.andi %6, %10 : vector<1x256xi1>
    %cst_40 = arith.constant 0.000000e+00 : f32
    %88 = vector.shape_cast %87 : vector<1x256xi1> to vector<1x256xi1>
    %89 = vector.broadcast %88 : vector<1x256xi1> to vector<4x256xi1>
    %90 = vector.broadcast %cst_40 : f32 to vector<4x256xf32>
    %91 = arith.select %89, %86, %90 : vector<4x256xi1>, vector<4x256xf32>
    %c0_41 = arith.constant 0 : index
    %c0_42 = arith.constant 0 : index
    %92 = vector.load %arg8[%c0_41, %c0_42] : memref<40x256xf32, #tpu.memory_space<vmem>>, vector<4x256xf32>
    tpu.vector_store %arg8[%c0_41, %c0_42], %91 {strides = array<i32>} : memref<40x256xf32, #tpu.memory_space<vmem>>, vector<4x256xf32>,
    %c16_i32_43 = arith.constant 16 : i32
    %93 = tpu.dynamic_rotate %85 by %c16_i32_43 dim 1 : vector<4x256xf32>, i32 -> vector<4x256xf32>
    %cst_44 = arith.constant 0.000000e+00 : f32
    %94 = vector.shape_cast %6 : vector<1x256xi1> to vector<1x256xi1>
    %95 = vector.broadcast %94 : vector<1x256xi1> to vector<4x256xi1>
    %96 = vector.broadcast %cst_44 : f32 to vector<4x256xf32>
    %97 = arith.select %95, %93, %96 : vector<4x256xi1>, vector<4x256xf32>
    %c4_45 = arith.constant 4 : index
    %c0_46 = arith.constant 0 : index
    %98 = vector.load %arg8[%c4_45, %c0_46] : memref<40x256xf32, #tpu.memory_space<vmem>>, vector<4x256xf32>
    tpu.vector_store %arg8[%c4_45, %c0_46], %97 {strides = array<i32>} : memref<40x256xf32, #tpu.memory_space<vmem>>, vector<4x256xf32>,
    %c15_i32_47 = arith.constant 15 : i32
    %99 = tpu.dynamic_rotate %85 by %c15_i32_47 dim 1 : vector<4x256xf32>, i32 -> vector<4x256xf32>
    %100 = arith.andi %6, %12 : vector<1x256xi1>
    %cst_48 = arith.constant 0.000000e+00 : f32
    %101 = vector.shape_cast %100 : vector<1x256xi1> to vector<1x256xi1>
    %102 = vector.broadcast %101 : vector<1x256xi1> to vector<4x256xi1>
    %103 = vector.broadcast %cst_48 : f32 to vector<4x256xf32>
    %104 = arith.select %102, %99, %103 : vector<4x256xi1>, vector<4x256xf32>
    %c8_49 = arith.constant 8 : index
    %c0_50 = arith.constant 0 : index
    %105 = vector.load %arg8[%c8_49, %c0_50] : memref<40x256xf32, #tpu.memory_space<vmem>>, vector<4x256xf32>
    tpu.vector_store %arg8[%c8_49, %c0_50], %104 {strides = array<i32>} : memref<40x256xf32, #tpu.memory_space<vmem>>, vector<4x256xf32>,
    %c1_i32_51 = arith.constant 1 : i32
    %106 = tpu.dynamic_rotate %85 by %c1_i32_51 dim 1 : vector<4x256xf32>, i32 -> vector<4x256xf32>
    %cst_52 = arith.constant 0.000000e+00 : f32
    %107 = vector.shape_cast %10 : vector<1x256xi1> to vector<1x256xi1>
    %108 = vector.broadcast %107 : vector<1x256xi1> to vector<4x256xi1>
    %109 = vector.broadcast %cst_52 : f32 to vector<4x256xf32>
    %110 = arith.select %108, %106, %109 : vector<4x256xi1>, vector<4x256xf32>
    %c12_53 = arith.constant 12 : index
    %c0_54 = arith.constant 0 : index
    %111 = vector.load %arg8[%c12_53, %c0_54] : memref<40x256xf32, #tpu.memory_space<vmem>>, vector<4x256xf32>
    tpu.vector_store %arg8[%c12_53, %c0_54], %110 {strides = array<i32>} : memref<40x256xf32, #tpu.memory_space<vmem>>, vector<4x256xf32>,
    %c16_55 = arith.constant 16 : index
    %c0_56 = arith.constant 0 : index
    %112 = vector.load %arg8[%c16_55, %c0_56] : memref<40x256xf32, #tpu.memory_space<vmem>>, vector<4x256xf32>
    tpu.vector_store %arg8[%c16_55, %c0_56], %85 {strides = array<i32>} : memref<40x256xf32, #tpu.memory_space<vmem>>, vector<4x256xf32>,
    %c255_i32_57 = arith.constant 255 : i32
    %113 = tpu.dynamic_rotate %85 by %c255_i32_57 dim 1 : vector<4x256xf32>, i32 -> vector<4x256xf32>
    %cst_58 = arith.constant 0.000000e+00 : f32
    %114 = vector.shape_cast %12 : vector<1x256xi1> to vector<1x256xi1>
    %115 = vector.broadcast %114 : vector<1x256xi1> to vector<4x256xi1>
    %116 = vector.broadcast %cst_58 : f32 to vector<4x256xf32>
    %117 = arith.select %115, %113, %116 : vector<4x256xi1>, vector<4x256xf32>
    %c20_59 = arith.constant 20 : index
    %c0_60 = arith.constant 0 : index
    %118 = vector.load %arg8[%c20_59, %c0_60] : memref<40x256xf32, #tpu.memory_space<vmem>>, vector<4x256xf32>
    tpu.vector_store %arg8[%c20_59, %c0_60], %117 {strides = array<i32>} : memref<40x256xf32, #tpu.memory_space<vmem>>, vector<4x256xf32>,
    %c241_i32_61 = arith.constant 241 : i32
    %119 = tpu.dynamic_rotate %85 by %c241_i32_61 dim 1 : vector<4x256xf32>, i32 -> vector<4x256xf32>
    %120 = arith.andi %8, %10 : vector<1x256xi1>
    %cst_62 = arith.constant 0.000000e+00 : f32
    %121 = vector.shape_cast %120 : vector<1x256xi1> to vector<1x256xi1>
    %122 = vector.broadcast %121 : vector<1x256xi1> to vector<4x256xi1>
    %123 = vector.broadcast %cst_62 : f32 to vector<4x256xf32>
    %124 = arith.select %122, %119, %123 : vector<4x256xi1>, vector<4x256xf32>
    %c24_63 = arith.constant 24 : index
    %c0_64 = arith.constant 0 : index
    %125 = vector.load %arg8[%c24_63, %c0_64] : memref<40x256xf32, #tpu.memory_space<vmem>>, vector<4x256xf32>
    tpu.vector_store %arg8[%c24_63, %c0_64], %124 {strides = array<i32>} : memref<40x256xf32, #tpu.memory_space<vmem>>, vector<4x256xf32>,
    %c240_i32_65 = arith.constant 240 : i32
    %126 = tpu.dynamic_rotate %85 by %c240_i32_65 dim 1 : vector<4x256xf32>, i32 -> vector<4x256xf32>
    %cst_66 = arith.constant 0.000000e+00 : f32
    %127 = vector.shape_cast %8 : vector<1x256xi1> to vector<1x256xi1>
    %128 = vector.broadcast %127 : vector<1x256xi1> to vector<4x256xi1>
    %129 = vector.broadcast %cst_66 : f32 to vector<4x256xf32>
    %130 = arith.select %128, %126, %129 : vector<4x256xi1>, vector<4x256xf32>
    %c28_67 = arith.constant 28 : index
    %c0_68 = arith.constant 0 : index
    %131 = vector.load %arg8[%c28_67, %c0_68] : memref<40x256xf32, #tpu.memory_space<vmem>>, vector<4x256xf32>
    tpu.vector_store %arg8[%c28_67, %c0_68], %130 {strides = array<i32>} : memref<40x256xf32, #tpu.memory_space<vmem>>, vector<4x256xf32>,
    %c239_i32_69 = arith.constant 239 : i32
    %132 = tpu.dynamic_rotate %85 by %c239_i32_69 dim 1 : vector<4x256xf32>, i32 -> vector<4x256xf32>
    %133 = arith.andi %8, %12 : vector<1x256xi1>
    %cst_70 = arith.constant 0.000000e+00 : f32
    %134 = vector.shape_cast %133 : vector<1x256xi1> to vector<1x256xi1>
    %135 = vector.broadcast %134 : vector<1x256xi1> to vector<4x256xi1>
    %136 = vector.broadcast %cst_70 : f32 to vector<4x256xf32>
    %137 = arith.select %135, %132, %136 : vector<4x256xi1>, vector<4x256xf32>
    %c32_71 = arith.constant 32 : index
    %c0_72 = arith.constant 0 : index
    %138 = vector.load %arg8[%c32_71, %c0_72] : memref<40x256xf32, #tpu.memory_space<vmem>>, vector<4x256xf32>
    tpu.vector_store %arg8[%c32_71, %c0_72], %137 {strides = array<i32>} : memref<40x256xf32, #tpu.memory_space<vmem>>, vector<4x256xf32>,
    %c36 = arith.constant 36 : index
    %c0_73 = arith.constant 0 : index
    %139 = vector.load %arg8[%c36, %c0_73] : memref<40x256xf32, #tpu.memory_space<vmem>>, vector<4x256xf32>
    tpu.vector_store %arg8[%c36, %c0_73], %18 {strides = array<i32>} : memref<40x256xf32, #tpu.memory_space<vmem>>, vector<4x256xf32>,
    %c0_74 = arith.constant 0 : index
    %c0_75 = arith.constant 0 : index
    %140 = vector.load %arg8[%c0_74, %c0_75] : memref<40x256xf32, #tpu.memory_space<vmem>>, vector<40x256xf32>
    %cst_76 = arith.constant dense<0.000000e+00> : vector<8x256xf32>
    %141 = tpu.matmul %15, %140, %cst_76 {dimension_numbers = #tpu.dot_dimension_numbers<[1], [0], [0], [1], [0, 0, 1, 1], [], []>} : vector<8x40xf32>, vector<40x256xf32>, vector<8x256xf32> -> vector<8x256xf32>
    %142 = vector.broadcast %16 : vector<8x1xf32> to vector<8x256xf32>
    %143 = arith.addf %141, %142 : vector<8x256xf32>
    %c0_77 = arith.constant 0 : index
    %c0_78 = arith.constant 0 : index
    %c0_79 = arith.constant 0 : index
    %144 = vector.load %arg6[%c0_77, %c0_78, %c0_79] : memref<1x8x256xf32, #tpu.memory_space<vmem>>, vector<1x8x256xf32>
    %145 = vector.shape_cast %144 : vector<1x8x256xf32> to vector<8x256xf32>
    %146 = vector.shape_cast %143 : vector<8x256xf32> to vector<1x8x256xf32>
    tpu.vector_store %arg6[%c0_77, %c0_78, %c0_79], %146 {strides = array<i32>} : memref<1x8x256xf32, #tpu.memory_space<vmem>>, vector<1x8x256xf32>,
    return
  }
  func.func @transform_0(%arg0: i32) -> (i32, i32, i32) {
    %c0_i32 = arith.constant 0 : i32
    %c0_i32_0 = arith.constant 0 : i32
    %c0_i32_1 = arith.constant 0 : i32
    return %arg0, %c0_i32, %c0_i32_0 : i32, i32, i32
  }
  func.func @transform_1(%arg0: i32) -> (i32, i32) {
    %c0_i32 = arith.constant 0 : i32
    %c0_i32_0 = arith.constant 0 : i32
    %c0_i32_1 = arith.constant 0 : i32
    return %c0_i32, %c0_i32_0 : i32, i32
  }
  func.func @transform_2(%arg0: i32) -> (i32, i32) {
    %c0_i32 = arith.constant 0 : i32
    %c0_i32_0 = arith.constant 0 : i32
    %c0_i32_1 = arith.constant 0 : i32
    return %c0_i32, %c0_i32_0 : i32, i32
  }
  func.func @transform_3(%arg0: i32) -> (i32, i32) {
    %c0_i32 = arith.constant 0 : i32
    %c0_i32_0 = arith.constant 0 : i32
    %c0_i32_1 = arith.constant 0 : i32
    return %c0_i32, %c0_i32_0 : i32, i32
  }
  func.func @transform_4(%arg0: i32) -> (i32, i32) {
    %c0_i32 = arith.constant 0 : i32
    %c0_i32_0 = arith.constant 0 : i32
    %c0_i32_1 = arith.constant 0 : i32
    return %c0_i32, %c0_i32_0 : i32, i32
  }
  func.func @transform_5(%arg0: i32) -> (i32, i32, i32) {
    %c0_i32 = arith.constant 0 : i32
    %c0_i32_0 = arith.constant 0 : i32
    %c0_i32_1 = arith.constant 0 : i32
    return %arg0, %c0_i32, %c0_i32_0 : i32, i32, i32
  }
}

</mosaic_0001>

<bundles_post_ra>
// kernel: tpu_custom_call.1
= control target key start
LH: loop header
LB: loop body
LE: loop exit
PB: predicated region body
PF: predicated region fallthrough
CT: control target
= control target key end

     0   :  { %10 = vsyncpa [#allocation5], 0  ;;  %s1446_s0 = inlined_call_operand.hbm [shape: f32[2,4,256], index: 0, kind: input, shape index: {}]   ;;  %s1447_s1 = inlined_call_operand.vmem [shape: f32[4,36], index: 1, kind: input, shape index: {}]   ;;  %s1448_s2 = inlined_call_operand.vmem [shape: f32[4,1], index: 2, kind: input, shape index: {}]   ;;  %s1449_s3 = inlined_call_operand.vmem [shape: f32[8,40], index: 3, kind: input, shape index: {}]   ;;  %s1450_s4 = inlined_call_operand.vmem [shape: f32[8,1], index: 4, kind: input, shape index: {}]   ;;  %s1451_s5 = inlined_call_operand.hbm [shape: f32[2,8,256], index: 5, kind: output, shape index: {}]  }
   0x1   :  { %12 = vsyncpa [#allocation5 + $0x1], 0 }
   0x2   :  { %13 = vsyncpa [#allocation6], 0 }
   0x3   :  { %15 = vsyncpa [#allocation6 + $0x1], 0  ;;  %s1017_s18 = smov 0   ;;  %s1019_s19 = smov 0  }
   0x4   :  { %s1021_s20 = smov 0   ;;  %s1023_s21 = smov 0  }
   0x5 LB: > { %s1038_s22 = sadd.s32 4294967295, %s976_s21   ;;  %s801_s23 = sadd.s32 4294967294, %s976_s21   ;;  %s976_s21 = sphi %s1023_s21, %s1504_s21   ;;  %s972_s20 = sphi %s1021_s20, %s1503_s20   ;;  %s968_s19 = sphi %s1019_s19, %s1502_s19   ;;  %s964_s18 = sphi %s1017_s18, %s1501_s18  }
   0x6   : > { %s1042_s24 = sadd.s32 1, %s976_s21   ;;  %s28_s25 = sadd.s32 1, %s972_s20 }
   0x7   : > { %s25_s26 = ssub.s32 %s976_s21, %s1042_s24  ;;  %p35_p0 = scmp.ne.s32.totalorder %s972_s20, %s968_s19 }
   0x8   : > { %p26_p1 = scmp.eq.s32.totalorder %s25_s26, 0  ;;  %p36_p2 = scmp.eq.s32.totalorder %s976_s21, 0 }
   0x9   : > { %p41_p3 = scmp.ne.s32.totalorder %s968_s19, %s964_s18  ;;  %p42_p4 = scmp.eq.s32.totalorder %s1038_s22, 0 }
   0xa   : > { %s1054_s27 = scalar_select %p26_p1, %s972_s20, %s28_s25  }
   0xb   : > { %p1056_p5 = por %p36_p2, %p35_p0  ;;  %p1060_p6 = por %p42_p4, %p41_p3 }
   0xc   : > { %p149_p7 = scmp.eq.s32.totalorder %s1038_s22, 1  ;;  %p155_p8 = scmp.eq.s32.totalorder %s801_s23, 1 }
   0xd   : > { %p835_p10 = scmp.lt.s32.totalorder %s976_s21, 2  ;;  %s187_s7 = sand.u32 1, %s972_s20  }
   0xe   : > { %p1067_p11 = por %p149_p7, %p35_p0  ;;  %p1071_p12 = por %p155_p8, %p41_p3 }
   0xf   : > { %s821_s8 = sshll.u32 %s976_s21, 3  ;;  %s804_s9 = sshll.u32 %s187_s7, 3 }
  0x10   : > { %s196_s12 = scalar_lea.hbm %s1446_s0, %s821_s8  ;;  %s191_s14 = scalar_lea.vmem [#allocation4], %s804_s9 }
  0x11   : > { %s198_s13 = sshll.u32 %s196_s12, 4  ;;  %s200_s15 = sshll.u32 %s191_s14, 4  ;;  %s199_s13 = int_to_ptr.hbm [resolvable:$true] %s198_s13  ;;  %s201_s15 = int_to_ptr.vmem [resolvable:$true] %s200_s15 }
  0x12   : > { %p1082_p13 = pnand %p835_p10, %p1056_p5  ;;  %p807_p0 = scmp.ge.s32.totalorder %s976_s21, 1 }
  0x13   : > { %p205_p1 = scmp.lt.s32.totalorder %s976_s21, 3  ;;  %s188_s17 = scalar_lea.sflag [#allocation5], %s187_s7 }
  0x14   : > { %s880_s23 = sshra.s32 %s199_s13, 4  ;;  %p884_p3 = pneg %p1082_p13  ;;  %s881_s23 = int_to_ptr.hbm [resolvable:$true] %s880_s23 }
  0x15   : > { %s882_s25 = scalar_lea.hbm %s881_s23, 8  ;;  %s887_s28 = scalar_lea.hbm %s1446_s0, 16 }
  0x16   : > { %p883_p2 = scmp.ne.s32.totalorder %s881_s23, %s882_s25  ;;  %p888_p5 = scmp.lt.s32.totalorder %s881_s23, %s1446_s0 }
  0x17   : > { %p889_p8 = scmp.lt.s32.totalorder %s887_s28, %s882_s25 }
  0x18   : > { %p885_p4 = pnand %p884_p3, %p883_p2 }
  0x19   : > { %p890_p10 = por %p889_p8, %p888_p5 }
  0x1a   : > { %p886_p7 = pneg %p885_p4 }
  0x1c   : > { %p891_p9 = pnand %p890_p10, %p886_p7 }
  0x1e   : > { %894 = shalt.err (!%p891_p9)
}
  0x1f   : > { %830 = dma.hbm_to_vmem [thread:$0]  (!%p1082_p13), %s199_s13, 128, %s201_s15, %s188_s17  }
  0x20   : > { %p206_p2 = pnand %p807_p0, %p205_p1 }
  0x21   : > { %s1103_s7 = sand.u32 (!%p206_p2), 1, %s968_s19  }
  0x22   : > { %209 = sbr.rel (%p206_p2) target bundleno = 690 (0x2b2), region = 40  ;;  %s808_s11 = sshll.u32 (!%p206_p2), %s1103_s7, 3 }
  0x23   : > { %s212_s12 = scalar_lea.sflag (!%p206_p2), [#allocation5], %s1103_s7  ;;  %s215_s14 = scalar_lea.vmem (!%p206_p2), [#allocation4], %s808_s11 }
  0x27   : > { %955 = dma.done.wait (%p1060_p6), %s212_s12, 128  }
  0x28   : > { %957 = vsyncadd (%p1060_p6), %s212_s12, 4294967168  ;;  %v262_v0 = vld [vmem:[%s215_s14] sm:$0xff]  ;;  %s978_s13 = smov 16   ;;  %s979_s29 = smov 15   ;;  %v243_v21 = vlaneseq  ;;  %v260_v44 = vld [vmem:[%s1449_s3] sm:$0xff] }
  0x29   : > { %vm263_vm0 = vcmp.gt.f32.partialorder %v262_v0, 0.0  ;;  %v264_v1 = vmul.f32 0.2, %v262_v0  ;;  %s980_s15 = smov 1   ;;  %s981_s16 = smov 127  }
  0x2a   : > { %s982_s17 = smov 113   ;;  %s983_s23 = smov 112   ;;  %v1127_v22 = vand.u32 127, %v243_v21 }
  0x2b   : > { %v265_v2 = vsel %vm263_vm0, %v262_v0, %v264_v1  ;;  %s984_s25 = smov 17   ;;  %s985_s26 = smov 111  }
  0x2c   : > { %267 = vst [vmem:[#allocation1] ss:$2 sm:$0xff] %v265_v2  ;;  %v245_v24 = vadd.s32 128, %v1127_v22  ;;  %v248_v25 = vshra.s32 %v1127_v22, 4  ;;  %vm1452_vm1 = vcmp.lt.s32.totalorder %v1127_v22, 16  ;;  %v246_v39 = vand.u32 15, %v1127_v22 }
  0x2d   : > { %vm1456_vm4 = vcmp.lt.s32.totalorder %v1127_v22, 1  ;;  %vm1460_vm9 = vcmp.lt.s32.totalorder %v1127_v22, 127  ;;  %vm1455_vm12 = vcmp.lt.s32.totalorder %v1127_v22, 113  ;;  %vm427_vm15 = vcmp.lt.s32.totalorder %v1127_v22, 112  ;;  %s715_s28 = scalar_lea.sflag [#allocation6], %s1103_s7  ;;  %s930_s12 = scalar_lea.hbm %s1451_s5, 32 }
  0x2e   : > { %v249_v26 = vshra.s32 %v245_v24, 4  ;;  %vm1132_vm2 = vcmp.ge.s32.totalorder %v248_v25, 1  ;;  %v247_v40 = vand.u32 15, %v245_v24  ;;  %vm1152_vm5 = vcmp.ge.s32.totalorder %v246_v39, 1 }
  0x2f   : > { %vm1160_vm7 = vcmp.lt.s32.totalorder %v246_v39, 15  ;;  %vm1185_vm10 = vcmp.lt.s32.totalorder %v248_v25, 15  ;;  %vm1457_vm0 = vmand %vm1132_vm2, %vm1152_vm5 }
  0x30   : > { %vm1136_vm3 = vcmp.ge.s32.totalorder %v249_v26, 1  ;;  %vm1156_vm6 = vcmp.ge.s32.totalorder %v247_v40, 1  ;;  %vm1164_vm8 = vcmp.lt.s32.totalorder %v247_v40, 15  ;;  %vm1189_vm11 = vcmp.lt.s32.totalorder %v249_v26, 15  ;;  %vm1454_vm13 = vmand %vm1185_vm10, %vm1152_vm5 }
  0x31   : > { %vm1453_vm14 = vmand %vm1189_vm11, %vm1156_vm6 }
  0x33   : > { %v268_v3 = vld.sshfl [vmem:[#allocation1] sm:$0xff pattern:$0x75316420]  ;;  %v269_v4 = vld.sshfl [vmem:[#allocation1 + $0x8] sm:$0xff pattern:$0x75316420] }
  0x34   : > { %289 = vst [vmem:[#allocation1] ss:$2 sm:$0xff] %v265_v2 }
  0x3b   : > { %v290_v5 = vld.sshfl [vmem:[#allocation1] sm:$0xff pattern:$0x75316420]  ;;  %v291_v6 = vld.sshfl [vmem:[#allocation1 + $0x8] sm:$0xff pattern:$0x75316420] }
  0x3c   : > { %315 = vst [vmem:[#allocation1] ss:$2 sm:$0xff] %v265_v2  ;;  %294 = vrot.lane.b32.xlu1 %v290_v5, %s978_s13  ;;  %296 = vrot.lane.b32.xlu2 %v291_v6, %s978_s13 }
  0x43   : > { %v316_v7 = vld.sshfl [vmem:[#allocation1] sm:$0xff pattern:$0x75316420]  ;;  %v317_v8 = vld.sshfl [vmem:[#allocation1 + $0x8] sm:$0xff pattern:$0x75316420] }
  0x44   : > { %320 = vrot.lane.b32.xlu0 %v316_v7, %s979_s29  ;;  %337 = vst [vmem:[#allocation1] ss:$2 sm:$0xff] %v265_v2  ;;  %v986_v7 = vmov 0  }
  0x45   : > { %878 = vset.pattern.permute.xlu1 %v986_v7  ;;  %879 = vset.pattern.permute.xlu0 %v986_v7 }
  0x4b   : > { %v338_v9 = vld.sshfl [vmem:[#allocation1] sm:$0xff pattern:$0x75316420]  ;;  %v339_v10 = vld.sshfl [vmem:[#allocation1 + $0x8] sm:$0xff pattern:$0x75316420] }
  0x4c   : > { %344 = vrot.lane.b32.xlu0 %v339_v10, %s980_s15  ;;  %363 = vst [vmem:[#allocation1] ss:$2 sm:$0xff] %v265_v2  ;;  %342 = vrot.lane.b32.xlu2 %v338_v9, %s980_s15 }
  0x53   : > { %v364_v11 = vld.sshfl [vmem:[#allocation1] sm:$0xff pattern:$0x75316420]  ;;  %v365_v12 = vld.sshfl [vmem:[#allocation1 + $0x8] sm:$0xff pattern:$0x75316420] }
  0x54   : > { %370 = vst [vmem:[#allocation1] ss:$2 sm:$0xff] %v265_v2 }
  0x55   : > { %368 = vst [vmem:[#allocation2 + $0x48] sm:$0xf] %v364_v11 }
  0x56   : > { %369 = vst [vmem:[#allocation2 + $0x28] sm:$0xf] %v365_v12 }
  0x5b   : > { %v371_v13 = vld.sshfl [vmem:[#allocation1] sm:$0xff pattern:$0x75316420]  ;;  %v372_v14 = vld.sshfl [vmem:[#allocation1 + $0x8] sm:$0xff pattern:$0x75316420] }
  0x5c   : > { %396 = vst [vmem:[#allocation1] ss:$2 sm:$0xff] %v265_v2  ;;  %375 = vrot.lane.b32.xlu2 %v371_v13, %s981_s16 }
  0x63   : > { %v397_v15 = vld.sshfl [vmem:[#allocation1] sm:$0xff pattern:$0x75316420]  ;;  %v398_v16 = vld.sshfl [vmem:[#allocation1 + $0x8] sm:$0xff pattern:$0x75316420] }
  0x64   : > { %401 = vrot.lane.b32.xlu0 %v397_v15, %s982_s17  ;;  %403 = vrot.lane.b32.xlu1 %v398_v16, %s982_s17  ;;  %418 = vst [vmem:[#allocation1] ss:$2 sm:$0xff] %v265_v2 }
  0x65   : > { %377 = vrot.lane.b32.xlu2 %v372_v14, %s981_s16 }
  0x6b   : > { %v419_v17 = vld.sshfl [vmem:[#allocation1] sm:$0xff pattern:$0x75316420]  ;;  %v420_v18 = vld.sshfl [vmem:[#allocation1 + $0x8] sm:$0xff pattern:$0x75316420] }
  0x6c   : > { %423 = vrot.lane.b32.xlu0 %v419_v17, %s983_s23  ;;  %444 = vst [vmem:[#allocation1] ss:$2 sm:$0xff] %v265_v2 }
  0x6d   : > { %272 = vrot.lane.b32.xlu2 %v268_v3, %s984_s25 }
  0x73   : > { %v445_v19 = vld.sshfl [vmem:[#allocation1] sm:$0xff pattern:$0x75316420]  ;;  %v446_v20 = vld.sshfl [vmem:[#allocation1 + $0x8] sm:$0xff pattern:$0x75316420] }
  0x74   : > { %425 = vrot.lane.b32.xlu0 %v420_v18, %s983_s23  ;;  %449 = vrot.lane.b32.xlu1 %v445_v19, %s985_s26  ;;  %646 = vst [vmem:[#allocation1 + $0x1] ss:$2 sm:$0xff] %v262_v0 }
  0x7c   : > { %274 = vrot.lane.b32.xlu0 %v269_v4, %s984_s25  ;;  %451 = vrot.lane.b32.xlu1 %v446_v20, %s985_s26  ;;  %v259_v4 = vld [vmem:[%s1448_s2] sm:$0xf] }
  0x84   : > { %322 = vrot.lane.b32.xlu1 %v317_v8, %s979_s29 }
  0x8c   : > { %478 = vperm.xlu1 %878, %v259_v4  }
  0x96   : > { %v297_v23 = vpop.permute.xlu2 %296 }
  0xa6   : > { %v343_v27 = vpop.permute.xlu2 %342 }
  0xae   : > { %v295_v30 = vpop.permute.xlu1 %294 }
  0xaf   : > { %v299_v31 = vsel %vm1452_vm1, %v295_v30, %v297_v23  ;;  %v300_v32 = vsel %vm1452_vm1, %v297_v23, %v295_v30  ;;  %vm1459_vm1 = vcmp.lt.s32.totalorder %v1127_v22, 17 }
  0xb0   : > { %v305_v33 = vsel %vm1132_vm2, %v300_v32, 0.0  ;;  %v306_v34 = vsel %vm1136_vm3, %v299_v31, 0.0 }
  0xb1   : > { %v309_v35 = vrot.slane %v305_v33, 4  ;;  %v310_v36 = vrot.slane %v306_v34, 4 }
  0xb3   : > { %313 = vst [vmem:[#allocation2 + $0x30] sm:$0xf0] %v309_v35 }
  0xb4   : > { %314 = vst [vmem:[#allocation2] sm:$0xf0] %v310_v36 }
  0xb6   : > { %v1148_v37 = vpop.permute.xlu0 %320  ;;  %v376_v38 = vpop.permute.xlu2 %375 }
  0xbe   : > { %v345_v43 = vpop.permute.xlu0 %344 }
  0xbf   : > { %v347_v46 = vsel %vm1456_vm4, %v343_v27, %v345_v43  ;;  %v348_v47 = vsel %vm1456_vm4, %v345_v43, %v343_v27  ;;  %v378_v48 = vpop.permute.xlu2 %377  ;;  %vm457_vm4 = vmand %vm1189_vm11, %vm1164_vm8  ;;  %v258_v43 = vld [vmem:[%s1447_s1] sm:$0xf] }
  0xc0   : > { %v353_v49 = vsel %vm1152_vm5, %v348_v47, 0.0  ;;  %v354_v50 = vsel %vm1156_vm6, %v347_v46, 0.0  ;;  %v380_v51 = vsel %vm1460_vm9, %v376_v38, %v378_v48  ;;  %v381_v52 = vsel %vm1460_vm9, %v378_v48, %v376_v38 }
  0xc1   : > { %v357_v53 = vrot.slane %v353_v49, 4  ;;  %v358_v54 = vrot.slane %v354_v50, 4  ;;  %v386_v55 = vsel %vm1160_vm7, %v380_v51, 0.0  ;;  %v387_v56 = vsel %vm1164_vm8, %v381_v52, 0.0 }
  0xc2   : > { %v390_v57 = vrot.slane %v386_v55, 4  ;;  %v391_v58 = vrot.slane %v387_v56, 4  ;;  %vm485_vm9 = vcmask 1043456  }
  0xc3   : > { %361 = vst [vmem:[#allocation2 + $0x18] sm:$0xf0] %v357_v53 }
  0xc4   : > { %362 = vst [vmem:[#allocation2 + $0x10] sm:$0xf0] %v358_v54 }
  0xc5   : > { %394 = vst [vmem:[#allocation2 + $0x48] sm:$0xf0] %v390_v57  ;;  %v647_v57 = vld.sshfl [vmem:[#allocation1] sm:$0xff pattern:$0x75316420] }
  0xc6   : > { %395 = vst [vmem:[#allocation2 + $0x28] sm:$0xf0] %v391_v58  ;;  %v648_v58 = vld.sshfl [vmem:[#allocation1 + $0x8] sm:$0xff pattern:$0x75316420] }
  0xc7   : > { %v273_v14 = vpop.permute.xlu2 %272  ;;  %651 = vst [vmem:[#allocation3 + $0x28] sm:$0xf0] %v647_v57 }
  0xc8   : > { %652 = vst [vmem:[#allocation3 + $0x20] sm:$0xf0] %v648_v58 }
  0xcd   : > { %v471_v38 = vld [vmem:[#allocation2 + $0x28] sm:$0xff] }
  0xd6   : > { %v402_v61 = vpop.permute.xlu0 %401  ;;  %v404_v62 = vpop.permute.xlu1 %403 }
  0xd7   : > { %v406_v63 = vsel %vm1455_vm12, %v402_v61, %v404_v62  ;;  %v407_v0 = vsel %vm1455_vm12, %v404_v62, %v402_v61  ;;  %vm456_vm12 = vmand %vm1185_vm10, %vm1160_vm7 }
  0xd8   : > { %v414_v1 = vsel %vm1454_vm13, %v406_v63, 0.0  ;;  %v415_v2 = vsel %vm1453_vm14, %v407_v0, 0.0  ;;  %vm1458_vm14 = vmand %vm1136_vm3, %vm1156_vm6  ;;  %vm453_vm13 = vcmp.lt.s32.totalorder %v1127_v22, 111 }
  0xd9   : > { %416 = vst [vmem:[#allocation2 + $0x8] sm:$0xf] %v414_v1 }
  0xda   : > { %417 = vst [vmem:[#allocation2 + $0x20] sm:$0xf] %v415_v2 }
  0xde   : > { %v424_v3 = vpop.permute.xlu0 %423 }
  0xe6   : > { %v426_v5 = vpop.permute.xlu0 %425  ;;  %v450_v6 = vpop.permute.xlu1 %449 }
  0xe7   : > { %v428_v8 = vsel %vm427_vm15, %v424_v3, %v426_v5  ;;  %v429_v9 = vsel %vm427_vm15, %v426_v5, %v424_v3 }
  0xe8   : > { %v434_v10 = vsel %vm1185_vm10, %v428_v8, 0.0  ;;  %v435_v11 = vsel %vm1189_vm11, %v429_v9, 0.0 }
  0xe9   : > { %v438_v12 = vrot.slane %v434_v10, 4  ;;  %v439_v13 = vrot.slane %v435_v11, 4 }
  0xeb   : > { %442 = vst [vmem:[#allocation2 + $0x8] sm:$0xf0] %v438_v12 }
  0xec   : > { %443 = vst [vmem:[#allocation2 + $0x20] sm:$0xf0] %v439_v13 }
  0xee   : > { %v275_v15 = vpop.permute.xlu0 %274  ;;  %v452_v16 = vpop.permute.xlu1 %451 }
  0xef   : > { %v277_v17 = vsel %vm1459_vm1, %v273_v14, %v275_v15  ;;  %v278_v18 = vsel %vm1459_vm1, %v275_v15, %v273_v14  ;;  %v454_v19 = vsel %vm453_vm13, %v450_v6, %v452_v16  ;;  %v455_v20 = vsel %vm453_vm13, %v452_v16, %v450_v6  ;;  %vm1461_vm1 = vmand %vm1136_vm3, %vm1164_vm8 }
  0xf0   : > { %v285_v21 = vsel %vm1457_vm0, %v278_v18, 0.0  ;;  %v286_v23 = vsel %vm1458_vm14, %v277_v17, 0.0  ;;  %v462_v24 = vsel %vm456_vm12, %v454_v19, 0.0  ;;  %v463_v25 = vsel %vm457_vm4, %v455_v20, 0.0  ;;  %vm1462_vm14 = vmand %vm1132_vm2, %vm1160_vm7 }
  0xf1   : > { %287 = vst [vmem:[#allocation2 + $0x30] sm:$0xf] %v285_v21  ;;  %vm324_vm0 = vcmp.lt.s32.totalorder %v1127_v22, 15 }
  0xf2   : > { %288 = vst [vmem:[#allocation2] sm:$0xf] %v286_v23  ;;  %v472_v35 = vld [vmem:[#allocation2 + $0x8] sm:$0xff] }
  0xf3   : > { %464 = vst [vmem:[#allocation2 + $0x40] sm:$0xf] %v462_v24  ;;  %v473_v36 = vld [vmem:[#allocation2 + $0x20] sm:$0xff] }
  0xf4   : > { %465 = vst [vmem:[#allocation2 + $0x38] sm:$0xf] %v463_v25  ;;  %v261_v25 = vld [vmem:[%s1450_s4] sm:$0xff] }
  0xf6   : > { %v323_v26 = vpop.permute.xlu1 %322 }
  0xf7   : > { %v325_v27 = vsel %vm324_vm0, %v1148_v37, %v323_v26  ;;  %v326_v30 = vsel %vm324_vm0, %v323_v26, %v1148_v37  ;;  %v470_v37 = vld [vmem:[#allocation2 + $0x48] sm:$0xff] }
  0xf8   : > { %v333_v31 = vsel %vm1462_vm14, %v326_v30, 0.0  ;;  %v334_v32 = vsel %vm1461_vm1, %v325_v27, 0.0  ;;  %vm481_vm1 = vcmask 293888   ;;  %v466_v46 = vld [vmem:[#allocation2 + $0x30] sm:$0xff] }
  0xf9   : > { %335 = vst [vmem:[#allocation2 + $0x18] sm:$0xf] %v333_v31  ;;  %v467_v47 = vld [vmem:[#allocation2] sm:$0xff] }
  0xfa   : > { %336 = vst [vmem:[#allocation2 + $0x10] sm:$0xf] %v334_v32  ;;  %v474_v33 = vld [vmem:[#allocation2 + $0x40] sm:$0xf] }
  0xfb   : > { %810 = vmatpush.msk.msra.mxu0 %vm485_vm9, %v474_v33  ;;  %v475_v34 = vld [vmem:[#allocation2 + $0x38] sm:$0xf] }
  0xfc   : > { %812 = vmatpush.msk.msra.mxu1 %vm485_vm9, %v475_v34 }
  0xfd   : > { %504 = vmatpush.msra.mxu0 %v472_v35 }
  0xfe   : > { %524 = vmatpush.msra.mxu1 %v473_v36  ;;  %v479_v48 = vpop.permute.xlu1 %478 }
  0xff   : > { %505 = vmatpush.msra.mxu0 %v470_v37 }
 0x100   : > { %525 = vmatpush.msra.mxu1 %v471_v38  ;;  %v468_v39 = vld [vmem:[#allocation2 + $0x18] sm:$0xff] }
 0x101   : > { %506 = vmatpush.msra.mxu0 %v468_v39  ;;  %v469_v40 = vld [vmem:[#allocation2 + $0x10] sm:$0xff] }
 0x102   : > { %526 = vmatpush.msra.mxu1 %v469_v40 }
 0x103   : > { %507 = vmatpush.msra.mxu0 %v466_v46 }
 0x104   : > { %527 = vmatpush.msra.mxu1 %v467_v47  ;;  %811 = vmatmul.msk.f32.vlgmr.msra.gmra.mxu0 %vm481_vm1, %v258_v43 }
 0x105   : > { %813 = vmatmul.msk.f32.vlgmr.msra.gmra.mxu1 %vm481_vm1, %v258_v43  ;;  %vm1484_vm1 = vcmp.lt.s32.totalorder %v1127_v22, 127 }
 0x181   : > { %v509_v49 = vpop.f32.mrf.mxu0 }
 0x182   : > { %v510_v50 = vadd.f32 %v509_v49, %v479_v48  ;;  %v529_v51 = vpop.f32.mrf.mxu1 }
 0x183   : > { %v530_v52 = vadd.f32 %v529_v51, %v479_v48 }
 0x184   : > { %vm532_vm9 = vcmp.gt.f32.partialorder %v510_v50, 0.0  ;;  %v534_v53 = vmul.f32 0.2, %v510_v50 }
 0x185   : > { %vm533_vm14 = vcmp.gt.f32.partialorder %v530_v52, 0.0  ;;  %v535_v54 = vmul.f32 0.2, %v530_v52 }
 0x186   : > { %v536_v55 = vsel %vm532_vm9, %v510_v50, %v534_v53  ;;  %vm1490_vm9 = vmand %vm1185_vm10, %vm1152_vm5 }
 0x187   : > { %590 = vst [vmem:[#allocation3 + $0x38] sm:$0xf] %v536_v55  ;;  %v537_v56 = vsel %vm533_vm14, %v530_v52, %v535_v54  ;;  %634 = vrot.lane.b32.xlu1 %v536_v55, %s985_s26  ;;  %618 = vrot.lane.b32.xlu2 %v536_v55, %s983_s23  ;;  %vm1488_vm14 = vcmp.lt.s32.totalorder %v1127_v22, 113 }
 0x188   : > { %591 = vst [vmem:[#allocation3 + $0x8] sm:$0xf] %v537_v56  ;;  %620 = vrot.lane.b32.xlu0 %v537_v56, %s983_s23 }
 0x18f   : > { %594 = vrot.lane.b32.xlu1 %v537_v56, %s981_s16  ;;  %636 = vrot.lane.b32.xlu2 %v537_v56, %s985_s26 }
 0x190   : > { %592 = vrot.lane.b32.xlu0 %v536_v55, %s981_s16 }
 0x197   : > { %574 = vrot.lane.b32.xlu1 %v536_v55, %s980_s15  ;;  %608 = vrot.lane.b32.xlu2 %v536_v55, %s982_s17 }
 0x198   : > { %610 = vrot.lane.b32.xlu0 %v537_v56, %s982_s17 }
 0x19f   : > { %550 = vrot.lane.b32.xlu1 %v537_v56, %s978_s13  ;;  %576 = vrot.lane.b32.xlu2 %v537_v56, %s980_s15  ;;  %s822_s15 = sshll.u32 %s1038_s22, 4 }
 0x1a0   : > { %548 = vrot.lane.b32.xlu0 %v536_v55, %s978_s13  ;;  %s726_s23 = scalar_lea.hbm %s1451_s5, %s822_s15 }
 0x1a1   : > { %s730_s8 = sshll.u32 %s726_s23, 4  ;;  %s731_s8 = int_to_ptr.hbm [resolvable:$true] %s730_s8 }
 0x1a2   : > { %s924_s9 = sshra.s32 %s731_s8, 4  ;;  %s925_s9 = int_to_ptr.hbm [resolvable:$true] %s924_s9 }
 0x1a3   : > { %s926_s22 = scalar_lea.hbm %s925_s9, 16  ;;  %p931_p0 = scmp.lt.s32.totalorder %s925_s9, %s1451_s5 }
 0x1a4   : > { %p927_p6 = scmp.ne.s32.totalorder %s925_s9, %s926_s22  ;;  %p932_p1 = scmp.lt.s32.totalorder %s930_s12, %s926_s22 }
 0x1a6   : > { %p928_p9 = pnand %p927_p6, %p1067_p11  ;;  %p933_p3 = por %p932_p1, %p931_p0 }
 0x1a7   : > { %538 = vrot.lane.b32.xlu1 %v536_v55, %s984_s25  ;;  %564 = vrot.lane.b32.xlu2 %v536_v55, %s979_s29 }
 0x1a8   : > { %566 = vrot.lane.b32.xlu0 %v537_v56, %s979_s29  ;;  %s809_s29 = sshll.u32 %s1103_s7, 4  ;;  %p929_p13 = pneg %p928_p9 }
 0x1aa   : > { %p934_p4 = pnand %p933_p3, %p929_p13 }
 0x1af   : > { %540 = vrot.lane.b32.xlu2 %v537_v56, %s984_s25  ;;  %s242_s25 = scalar_lea.vmem [#allocation7], %s809_s29 }
 0x1b0   : > { %665 = vperm.xlu0 %879, %v261_v25   ;;  %s728_s26 = sshll.u32 %s242_s25, 4  ;;  %s729_s26 = int_to_ptr.vmem [resolvable:$true] %s728_s26 }
 0x1e1   : > { %v619_v61 = vpop.permute.xlu2 %618 }
 0x1e9   : > { %v637_v62 = vpop.permute.xlu2 %636 }
 0x1f1   : > { %v609_v3 = vpop.permute.xlu2 %608 }
 0x1f9   : > { %v635_v63 = vpop.permute.xlu1 %634  ;;  %v577_v20 = vpop.permute.xlu2 %576 }
 0x1fa   : > { %v621_v0 = vpop.permute.xlu0 %620  ;;  %v638_v1 = vsel %vm453_vm13, %v635_v63, %v637_v62  ;;  %v639_v2 = vsel %vm453_vm13, %v637_v62, %v635_v63 }
 0x1fb   : > { %v622_v4 = vsel %vm427_vm15, %v619_v61, %v621_v0  ;;  %v623_v5 = vsel %vm427_vm15, %v621_v0, %v619_v61  ;;  %v640_v6 = vsel %vm456_vm12, %v638_v1, 0.0  ;;  %v641_v7 = vsel %vm457_vm4, %v639_v2, 0.0  ;;  %vm1485_vm12 = vmmov %vm1484_vm1 }
 0x1fc   : > { %v624_v8 = vsel %vm1185_vm10, %v622_v4, 0.0  ;;  %v625_v9 = vsel %vm1189_vm11, %v623_v5, 0.0  ;;  %642 = vst [vmem:[#allocation3 + $0x28] sm:$0xf] %v640_v6  ;;  %vm1486_vm4 = vcmp.lt.s32.totalorder %v1127_v22, 1  ;;  %vm1489_vm15 = vmmov %vm1488_vm14 }
 0x1fd   : > { %v628_v10 = vrot.slane %v624_v8, 4  ;;  %v629_v11 = vrot.slane %v625_v9, 4  ;;  %643 = vst [vmem:[#allocation3 + $0x20] sm:$0xf] %v641_v7  ;;  %vm1487_vm13 = vmmov %vm1486_vm4 }
 0x1ff   : > { %632 = vst [vmem:[#allocation3 + $0x30] sm:$0xf0] %v628_v10 }
 0x200   : > { %633 = vst [vmem:[#allocation3 + $0x18] sm:$0xf0] %v629_v11 }
 0x201   : > { %v595_v12 = vpop.permute.xlu1 %594  ;;  %v565_v39 = vpop.permute.xlu2 %564 }
 0x202   : > { %v593_v13 = vpop.permute.xlu0 %592 }
 0x203   : > { %v596_v14 = vsel %vm1484_vm1, %v593_v13, %v595_v12  ;;  %v597_v15 = vsel %vm1485_vm12, %v595_v12, %v593_v13  ;;  %v661_v16 = vld [vmem:[#allocation3 + $0x28] sm:$0xff]  ;;  %vm1491_vm1 = vmand %vm1189_vm11, %vm1156_vm6  ;;  %vm1492_vm12 = vcmp.lt.s32.totalorder %v1127_v22, 16  ;;  %vm1494_vm11 = vcmp.lt.s32.totalorder %v1127_v22, 17 }
 0x204   : > { %v598_v17 = vsel %vm1160_vm7, %v596_v14, 0.0  ;;  %v599_v18 = vsel %vm1164_vm8, %v597_v15, 0.0  ;;  %683 = vmatpush.msra.mxu2 %v661_v16  ;;  %v662_v19 = vld [vmem:[#allocation3 + $0x20] sm:$0xff]  ;;  %vm1493_vm10 = vmmov %vm1492_vm12 }
 0x205   : > { %v602_v21 = vrot.slane %v598_v17, 4  ;;  %v603_v23 = vrot.slane %v599_v18, 4  ;;  %703 = vmatpush.msra.mxu3 %v662_v19 }
 0x207   : > { %606 = vst [vmem:[#allocation3 + $0x38] sm:$0xf0] %v602_v21 }
 0x208   : > { %607 = vst [vmem:[#allocation3 + $0x8] sm:$0xf0] %v603_v23 }
 0x209   : > { %v575_v24 = vpop.permute.xlu1 %574  ;;  %v541_v54 = vpop.permute.xlu2 %540 }
 0x20a   : > { %v611_v26 = vpop.permute.xlu0 %610  ;;  %v578_v27 = vsel %vm1486_vm4, %v575_v24, %v577_v20  ;;  %v579_v30 = vsel %vm1487_vm13, %v577_v20, %v575_v24  ;;  %vm1495_vm4 = vmmov %vm1494_vm11 }
 0x20b   : > { %v612_v31 = vsel %vm1488_vm14, %v609_v3, %v611_v26  ;;  %v613_v32 = vsel %vm1489_vm15, %v611_v26, %v609_v3  ;;  %v580_v33 = vsel %vm1152_vm5, %v579_v30, 0.0  ;;  %v581_v34 = vsel %vm1156_vm6, %v578_v27, 0.0  ;;  %vm1496_vm13 = vmand %vm1132_vm2, %vm1152_vm5 }
 0x20c   : > { %v614_v35 = vsel %vm1490_vm9, %v612_v31, 0.0  ;;  %v615_v36 = vsel %vm1491_vm1, %v613_v32, 0.0  ;;  %v584_v37 = vrot.slane %v580_v33, 4  ;;  %v585_v38 = vrot.slane %v581_v34, 4  ;;  %vm1497_vm14 = vmand %vm1132_vm2, %vm1160_vm7 }
 0x20d   : > { %616 = vst [vmem:[#allocation3 + $0x30] sm:$0xf] %v614_v35  ;;  %vm1498_vm15 = vmand %vm1136_vm3, %vm1164_vm8 }
 0x20e   : > { %617 = vst [vmem:[#allocation3 + $0x18] sm:$0xf] %v615_v36  ;;  %v657_v52 = vld [vmem:[#allocation3 + $0x38] sm:$0xff] }
 0x20f   : > { %588 = vst [vmem:[#allocation3 + $0x10] sm:$0xf0] %v584_v37  ;;  %v658_v53 = vld [vmem:[#allocation3 + $0x8] sm:$0xff] }
 0x210   : > { %589 = vst [vmem:[#allocation3 + $0x40] sm:$0xf0] %v585_v38 }
 0x211   : > { %v551_v40 = vpop.permute.xlu1 %550 }
 0x212   : > { %v549_v43 = vpop.permute.xlu0 %548 }
 0x213   : > { %v552_v59 = vsel %vm1492_vm12, %v549_v43, %v551_v40  ;;  %v553_v46 = vsel %vm1493_vm10, %v551_v40, %v549_v43 }
 0x214   : > { %v554_v60 = vsel %vm1132_vm2, %v553_v46, 0.0  ;;  %v555_v47 = vsel %vm1136_vm3, %v552_v59, 0.0  ;;  %v659_v48 = vld [vmem:[#allocation3 + $0x30] sm:$0xff]  ;;  %vm668_vm2 = vcmask 326656  }
 0x215   : > { %v558_v49 = vrot.slane %v554_v60, 4  ;;  %v559_v50 = vrot.slane %v555_v47, 4  ;;  %684 = vmatpush.msra.mxu2 %v659_v48  ;;  %v660_v51 = vld [vmem:[#allocation3 + $0x18] sm:$0xff] }
 0x216   : > { %704 = vmatpush.msra.mxu3 %v660_v51 }
 0x217   : > { %562 = vst [vmem:[#allocation3 + $0x48] sm:$0xf0] %v558_v49  ;;  %685 = vmatpush.msra.mxu2 %v657_v52 }
 0x218   : > { %563 = vst [vmem:[#allocation3] sm:$0xf0] %v559_v50  ;;  %705 = vmatpush.msra.mxu3 %v658_v53 }
 0x219   : > { %v539_v55 = vpop.permute.xlu1 %538 }
 0x21a   : > { %v567_v56 = vpop.permute.xlu0 %566  ;;  %v542_v57 = vsel %vm1494_vm11, %v539_v55, %v541_v54  ;;  %v543_v58 = vsel %vm1495_vm4, %v541_v54, %v539_v55 }
 0x21b   : > { %v568_v61 = vsel %vm324_vm0, %v565_v39, %v567_v56  ;;  %v569_v62 = vsel %vm324_vm0, %v567_v56, %v565_v39  ;;  %v544_v63 = vsel %vm1496_vm13, %v543_v58, 0.0  ;;  %vm1499_vm0 = vmand %vm1136_vm3, %vm1156_vm6 }
 0x21c   : > { %v570_v0 = vsel %vm1497_vm14, %v569_v62, 0.0  ;;  %v571_v1 = vsel %vm1498_vm15, %v568_v61, 0.0  ;;  %v545_v22 = vsel %vm1499_vm0, %v542_v57, 0.0  ;;  %546 = vst [vmem:[#allocation3 + $0x48] sm:$0xf] %v544_v63 }
 0x21d   : > { %572 = vst [vmem:[#allocation3 + $0x10] sm:$0xf] %v570_v0 }
 0x21e   : > { %573 = vst [vmem:[#allocation3 + $0x40] sm:$0xf] %v571_v1 }
 0x21f   : > { %547 = vst [vmem:[#allocation3] sm:$0xf] %v545_v22 }
 0x222   : > { %v666_v45 = vpop.permute.xlu0 %665 }
 0x223   : > { %v653_v29 = vld [vmem:[#allocation3 + $0x48] sm:$0xff] }
 0x224   : > { %v655_v28 = vld [vmem:[#allocation3 + $0x10] sm:$0xff] }
 0x225   : > { %686 = vmatpush.msra.mxu2 %v655_v28  ;;  %v656_v41 = vld [vmem:[#allocation3 + $0x40] sm:$0xff] }
 0x226   : > { %706 = vmatpush.msra.mxu3 %v656_v41  ;;  %v654_v42 = vld [vmem:[#allocation3] sm:$0xff] }
 0x227   : > { %687 = vmatpush.msra.mxu2 %v653_v29 }
 0x228   : > { %707 = vmatpush.msra.mxu3 %v654_v42  ;;  %814 = vmatmul.msk.f32.vlgmr.msra.gmra.mxu2 %vm668_vm2, %v260_v44 }
 0x229   : > { %815 = vmatmul.msk.f32.vlgmr.msra.gmra.mxu3 %vm668_vm2, %v260_v44 }
 0x2ab   : > { %v689_v2 = vpop.f32.mrf.mxu2 }
 0x2ac   : > { %v690_v3 = vadd.f32 %v689_v2, %v666_v45  ;;  %v709_v4 = vpop.f32.mrf.mxu3 }
 0x2ad   : > { %v710_v5 = vadd.f32 %v709_v4, %v666_v45 }
 0x2ae   : > { %712 = vst [vmem:[%s242_s25] sm:$0xff] %v690_v3 }
 0x2af   : > { %713 = vst [vmem:[%s242_s25 + $0x8] sm:$0xff] %v710_v5 }
 0x2b0   : > { %937 = shalt.err (!%p934_p4)
}
 0x2b1   : > { %825 = dma.vmem_to_hbm [thread:$0]  (%p1067_p11), %s729_s26, 256, %s731_s8, %s715_s28  }
 0x2b2 PF: > { %s742_s7 = sand.u32 1, %s964_s18   ;;  %p1500_p7 = scmp.ge.s32.totalorder %s976_s21, 2 }
 0x2b3   : > { %s743_s29 = scalar_lea.sflag [#allocation6], %s742_s7 }
 0x2b4   : > { %p832_p5 = pnand %p1500_p7, %p1071_p12 }
 0x2b6   : > { %p833_p8 = pneg %p832_p5 }
 0x2b8   : > { %959 = dma.done.wait (%p833_p8), %s743_s29, 256  }
 0x2b9   : > { %961 = vsyncadd (%p833_p8), %s743_s29, 4294967040  ;;  %p18_p10 = scmp.ge.s32.totalorder %s1042_s24, 4   ;;  %s1501_s18 = smov %s968_s19 }
 0x2ba   : > { %s1502_s19 = smov %s972_s20  ;;  %s1503_s20 = smov %s1054_s27 }
 0x2bb   : > { %s1504_s21 = smov %s1042_s24  ;;  %20 = sbr.rel (!%p18_p10) target bundleno = 5 (0x5), region = 86 }
 0x2c0   :  { %749 = vsyncpa [#allocation5], 1 }
 0x2c1   :  { %751 = vsyncpa [#allocation5 + $0x1], 1 }
 0x2c2   :  { %752 = vsyncpa [#allocation6], 1 }
 0x2c3   :  { %754 = vsyncpa [#allocation6 + $0x1], 1 }

</bundles_post_ra>
